<compile_context>
chip_gen: v7x
topology: tpu7x:2x2x1
jax: 0.10.0
libtpu: 0.0.40
codegen_flags: <defaults>
</compile_context>

<pallas_src>
import functools
from typing import NamedTuple

import jax
import jax.numpy as jnp
from jax.experimental import pallas as pl
from jax.experimental.pallas import tpu as pltpu


def _round_up(x: int, m: int) -> int:
    return ((x + m - 1) // m) * m


# --------------------------------------------------------------------------- #
# Kernel
# --------------------------------------------------------------------------- #
def agent_kernel(obs_ref, w1_ref, w2_ref, w3_ref, bias_ref, out_ref, *, h2, out_pad):
    """One batch tile: (TB, obs_dim) -> (TB, out_pad) fused actor+critic MLP."""
    x = obs_ref[...]                                   # (TB, obs_dim), f32 from HBM

    b1 = bias_ref[0:1, :h2]                            # (1, 2H)      fused [ab1 | cb1]
    b2 = bias_ref[1:2, :h2]                            # (1, 2H)      fused [ab2 | cb2]
    b3 = bias_ref[2:3, :out_pad]                       # (1, out_pad) fused [ab3 | cb3 | 0]

    # Layer 1: one lane-dense matmul covering both actor and critic.
    # Operands cast to the weight dtype (f32 no-op / bf16 MXU path); accumulate f32.
    h = jnp.tanh(
        jnp.dot(x.astype(w1_ref.dtype), w1_ref[...],
                preferred_element_type=jnp.float32) + b1
    )
    # Layer 2: block-diagonal (2H, 2H) keeps actor/critic independent.
    h = jnp.tanh(
        jnp.dot(h.astype(w2_ref.dtype), w2_ref[...],
                preferred_element_type=jnp.float32) + b2
    )
    # Layer 3: block-structured heads, narrow lane-padded output slab.
    out_ref[...] = (
        jnp.dot(h.astype(w3_ref.dtype), w3_ref[...],
                preferred_element_type=jnp.float32) + b3
    )


# --------------------------------------------------------------------------- #
# Parameter fusion — run ONCE per weight update, outside the forward hot path.
# --------------------------------------------------------------------------- #
class FusedParams(NamedTuple):
    w1: jax.Array        # (obs_dim, 2H)
    w2: jax.Array        # (2H, 2H) block-diagonal
    w3: jax.Array        # (2H, out_pad) block-structured heads
    bias: jax.Array      # (8, max(2H, out_pad)) f32 bias pack (rows 0/1/2 used)
    h2: int
    out_pad: int
    act_dim: int


def fuse_params(actor_params, critic_params, compute_dtype=jnp.float32) -> FusedParams:
    aw1, ab1, aw2, ab2, aw3, ab3 = actor_params
    cw1, cb1, cw2, cb2, cw3, cb3 = critic_params

    obs_dim, hidden = aw1.shape
    act_dim = aw3.shape[1]
    h2 = 2 * hidden
    out_pad = _round_up(act_dim + 1, 8)               # narrow output slab (HBM bytes)
    bias_w = max(h2, out_pad)

    # W1: (obs_dim, 2H) = [aw1 | cw1]
    w1 = jnp.concatenate([aw1, cw1], axis=1).astype(compute_dtype)

    # W2: (2H, 2H) block-diagonal
    w2 = jnp.zeros((h2, h2), jnp.float32)
    w2 = w2.at[:hidden, :hidden].set(aw2).at[hidden:, hidden:].set(cw2)
    w2 = w2.astype(compute_dtype)

    # W3: (2H, out_pad); actor head cols [0, act_dim), critic head col act_dim.
    w3 = jnp.zeros((h2, out_pad), jnp.float32)
    w3 = w3.at[:hidden, :act_dim].set(aw3)
    w3 = w3.at[hidden:, act_dim:act_dim + 1].set(cw3)
    w3 = w3.astype(compute_dtype)

    # Bias pack: single (8, bias_w) f32 tile (biases stay f32 -> VPU adds stay f32).
    bias = jnp.zeros((8, bias_w), jnp.float32)
    bias = bias.at[0, :h2].set(jnp.concatenate([ab1, cb1], axis=1)[0])
    bias = bias.at[1, :h2].set(jnp.concatenate([ab2, cb2], axis=1)[0])
    bias = bias.at[2, :act_dim].set(ab3[0])
    bias = bias.at[2, act_dim].set(cb3[0, 0])

    return FusedParams(w1, w2, w3, bias, h2, out_pad, act_dim)


# --------------------------------------------------------------------------- #
# Forward wrapper (hot path): takes pre-fused params, no pad, no per-call fusion.
# --------------------------------------------------------------------------- #
def agent_forward(obs, fused: FusedParams, *, tile_b=1024):
    """obs: (B, obs_dim). Returns (logits (B, act_dim), value (B, 1)) in f32."""
    B, obs_dim = obs.shape
    w1, w2, w3, bias, h2, out_pad, act_dim = fused
    assert w1.shape[0] == obs_dim

    # Batch tile: multiple of 8, big enough to amortize the ~0.35 us/step overhead,
    # capped so the grid has >=2 steps whenever B > 8 (v7x: both TCs get work).
    if B <= 8:
        tb = 8
    else:
        tb = max(8, min(tile_b, _round_up((B + 1) // 2, 8)))
    grid = (pl.cdiv(B, tb),)        # ragged edge block handled by Pallas (no jnp.pad)

    kernel = functools.partial(agent_kernel, h2=h2, out_pad=out_pad)

    out = pl.pallas_call(
        kernel,
        out_shape=jax.ShapeDtypeStruct((B, out_pad), jnp.float32),
        grid=grid,
        in_specs=[
            pl.BlockSpec((tb, obs_dim), lambda i: (i, 0)),         # obs tile (pipelined)
            pl.BlockSpec((obs_dim, h2), lambda i: (0, 0)),         # W1 (VMEM resident)
            pl.BlockSpec((h2, h2), lambda i: (0, 0)),              # W2 (VMEM resident)
            pl.BlockSpec((h2, out_pad), lambda i: (0, 0)),         # W3 (VMEM resident)
            pl.BlockSpec(bias.shape, lambda i: (0, 0)),            # bias pack
        ],
        out_specs=pl.BlockSpec((tb, out_pad), lambda i: (i, 0)),   # narrow output slab
        compiler_params=pltpu.CompilerParams(
            dimension_semantics=("parallel",),          # megacore batch split on v7x
            vmem_limit_bytes=32 * 1024 * 1024,          # safe on v5e/v6e/v7x; not a tile cap
        ),
    )(obs, w1, w2, w3, bias)

    logits = out[:, :act_dim]
    value = out[:, act_dim:act_dim + 1]
    return logits, value


# --------------------------------------------------------------------------- #
# Deterministic PyTorch-style init + pure-JAX reference
# --------------------------------------------------------------------------- #
def _init_linear(key, fan_in, fan_out):
    kw, kb = jax.random.split(key)
    bound = 1.0 / jnp.sqrt(jnp.float32(fan_in))
    w = jax.random.uniform(kw, (fan_in, fan_out), jnp.float32, -bound, bound)
    b = jax.random.uniform(kb, (1, fan_out), jnp.float32, -bound, bound)
    return w, b


def make_params(key, obs_dim, hidden, act_dim):
    keys = jax.random.split(key, 6)
    aw1, ab1 = _init_linear(keys[0], obs_dim, hidden)
    aw2, ab2 = _init_linear(keys[1], hidden, hidden)
    aw3, ab3 = _init_linear(keys[2], hidden, act_dim)
    cw1, cb1 = _init_linear(keys[3], obs_dim, hidden)
    cw2, cb2 = _init_linear(keys[4], hidden, hidden)
    cw3, cb3 = _init_linear(keys[5], hidden, 1)
    return (aw1, ab1, aw2, ab2, aw3, ab3), (cw1, cb1, cw2, cb2, cw3, cb3)


def reference_forward(obs, actor_params, critic_params):
    aw1, ab1, aw2, ab2, aw3, ab3 = actor_params
    cw1, cb1, cw2, cb2, cw3, cb3 = critic_params
    h = jnp.tanh(obs @ aw1 + ab1)
    h = jnp.tanh(h @ aw2 + ab2)
    logits = h @ aw3 + ab3
    c = jnp.tanh(obs @ cw1 + cb1)
    c = jnp.tanh(c @ cw2 + cb2)
    value = c @ cw3 + cb3
    return logits, value


if __name__ == "__main__":
    obs_dim, hidden, act_dim = 32, 64, 8
    key = jax.random.PRNGKey(0)
    k_params, k_obs, k_obs2 = jax.random.split(key, 3)
    actor_params, critic_params = make_params(k_params, obs_dim, hidden, act_dim)

    # Fuse ONCE outside the hot path (f32 compute path: exact reference match).
    fused_f32 = fuse_params(actor_params, critic_params, jnp.float32)

    # --- small batch, single grid step ------------------------------------
    B = 8
    obs = jax.random.normal(k_obs, (B, obs_dim), dtype=jnp.float32)
    logits, value = agent_forward(obs, fused_f32)
    jax.block_until_ready((logits, value))
    ref_logits, ref_value = reference_forward(obs, actor_params, critic_params)
    assert logits.shape == (B, act_dim) and value.shape == (B, 1)
    assert jnp.allclose(logits, ref_logits, atol=1e-5, rtol=1e-5)
    assert jnp.allclose(value, ref_value, atol=1e-5, rtol=1e-5)

    # --- non-divisible batch: ragged edge block, 2-step parallel grid ------
    B2 = 20
    obs2 = jax.random.normal(k_obs2, (B2, obs_dim), dtype=jnp.float32)
    logits2, value2 = agent_forward(obs2, fused_f32)     # tb=16 -> grid=2, edge=4 rows
    jax.block_until_ready((logits2, value2))
    ref_logits2, ref_value2 = reference_forward(obs2, actor_params, critic_params)
    assert logits2.shape == (B2, act_dim) and value2.shape == (B2, 1)
    assert jnp.allclose(logits2, ref_logits2, atol=1e-5, rtol=1e-5)
    assert jnp.allclose(value2, ref_value2, atol=1e-5, rtol=1e-5)

    # --- bf16 MXU path (f32 accumulation + f32 tanh/bias), loosened tol ----
    fused_bf16 = fuse_params(actor_params, critic_params, jnp.bfloat16)
    logits3, value3 = agent_forward(obs2, fused_bf16)
    jax.block_until_ready((logits3, value3))
    assert jnp.allclose(logits3, ref_logits2, atol=3e-2, rtol=3e-2)
    assert jnp.allclose(value3, ref_value2, atol=3e-2, rtol=3e-2)

    print("KERNEL_OK")
</pallas_src>

<mosaic_0001>
module attributes {stable_mosaic.version = 11 : i64} {
  func.func @agent_kernel(%arg0: i32, %arg1: memref<8x32xf32, #tpu.memory_space<vmem>>, %arg2: memref<32x128xf32, #tpu.memory_space<vmem>>, %arg3: memref<128x128xf32, #tpu.memory_space<vmem>>, %arg4: memref<128x16xf32, #tpu.memory_space<vmem>>, %arg5: memref<8x128xf32, #tpu.memory_space<vmem>>, %arg6: memref<8x16xf32, #tpu.memory_space<vmem>>) attributes {dimension_semantics = [#tpu.dimension_semantics<parallel>], iteration_bounds = array<i64: 1>, scalar_prefetch = 0 : i64, scratch_operands = 0 : i64, tpu.core_type = #tpu.core_type<tc>, window_params = [{transform_indices = @transform_0, window_bounds = array<i64: 8, 32>}, {pipeline_mode = #tpu.pipeline_mode<synchronous>, transform_indices = @transform_1, window_bounds = array<i64: 32, 128>}, {pipeline_mode = #tpu.pipeline_mode<synchronous>, transform_indices = @transform_2, window_bounds = array<i64: 128, 128>}, {pipeline_mode = #tpu.pipeline_mode<synchronous>, transform_indices = @transform_3, window_bounds = array<i64: 128, 16>}, {pipeline_mode = #tpu.pipeline_mode<synchronous>, transform_indices = @transform_4, window_bounds = array<i64: 8, 128>}, {transform_indices = @transform_5, window_bounds = array<i64: 8, 16>}]} {
    %c0 = arith.constant 0 : index
    %c0_0 = arith.constant 0 : index
    %0 = vector.load %arg1[%c0, %c0_0] : memref<8x32xf32, #tpu.memory_space<vmem>>, vector<8x32xf32>
    %c0_1 = arith.constant 0 : index
    %c0_2 = arith.constant 0 : index
    %1 = vector.load %arg5[%c0_1, %c0_2] : memref<8x128xf32, #tpu.memory_space<vmem>>, vector<1x128xf32>
    %c1 = arith.constant 1 : index
    %c0_3 = arith.constant 0 : index
    %2 = vector.load %arg5[%c1, %c0_3] : memref<8x128xf32, #tpu.memory_space<vmem>>, vector<1x128xf32>
    %c2 = arith.constant 2 : index
    %c0_4 = arith.constant 0 : index
    %3 = vector.load %arg5[%c2, %c0_4] : memref<8x128xf32, #tpu.memory_space<vmem>>, vector<1x16xf32>
    %c0_5 = arith.constant 0 : index
    %c0_6 = arith.constant 0 : index
    %4 = vector.load %arg2[%c0_5, %c0_6] : memref<32x128xf32, #tpu.memory_space<vmem>>, vector<32x128xf32>
    %cst = arith.constant dense<0.000000e+00> : vector<8x128xf32>
    %5 = tpu.matmul %0, %4, %cst {dimension_numbers = #tpu.dot_dimension_numbers<[1], [0], [0], [1], [0, 0, 1, 1], [], []>} : vector<8x32xf32>, vector<32x128xf32>, vector<8x128xf32> -> vector<8x128xf32>
    %6 = vector.broadcast %1 : vector<1x128xf32> to vector<8x128xf32>
    %7 = arith.addf %5, %6 : vector<8x128xf32>
    %8 = math.tanh %7 : vector<8x128xf32>
    %c0_7 = arith.constant 0 : index
    %c0_8 = arith.constant 0 : index
    %9 = vector.load %arg3[%c0_7, %c0_8] : memref<128x128xf32, #tpu.memory_space<vmem>>, vector<128x128xf32>
    %cst_9 = arith.constant dense<0.000000e+00> : vector<8x128xf32>
    %10 = tpu.matmul %8, %9, %cst_9 {dimension_numbers = #tpu.dot_dimension_numbers<[1], [0], [0], [1], [0, 0, 1, 1], [], []>} : vector<8x128xf32>, vector<128x128xf32>, vector<8x128xf32> -> vector<8x128xf32>
    %11 = vector.broadcast %2 : vector<1x128xf32> to vector<8x128xf32>
    %12 = arith.addf %10, %11 : vector<8x128xf32>
    %13 = math.tanh %12 : vector<8x128xf32>
    %c0_10 = arith.constant 0 : index
    %c0_11 = arith.constant 0 : index
    %14 = vector.load %arg4[%c0_10, %c0_11] : memref<128x16xf32, #tpu.memory_space<vmem>>, vector<128x16xf32>
    %cst_12 = arith.constant dense<0.000000e+00> : vector<8x16xf32>
    %15 = tpu.matmul %13, %14, %cst_12 {dimension_numbers = #tpu.dot_dimension_numbers<[1], [0], [0], [1], [0, 0, 1, 1], [], []>} : vector<8x128xf32>, vector<128x16xf32>, vector<8x16xf32> -> vector<8x16xf32>
    %16 = vector.broadcast %3 : vector<1x16xf32> to vector<8x16xf32>
    %17 = arith.addf %15, %16 : vector<8x16xf32>
    %c0_13 = arith.constant 0 : index
    %c0_14 = arith.constant 0 : index
    %18 = vector.load %arg6[%c0_13, %c0_14] : memref<8x16xf32, #tpu.memory_space<vmem>>, vector<8x16xf32>
    tpu.vector_store %arg6[%c0_13, %c0_14], %17 {strides = array<i32>} : memref<8x16xf32, #tpu.memory_space<vmem>>, vector<8x16xf32>,
    return
  }
  func.func @transform_0(%arg0: i32) -> (i32, i32) {
    %c0_i32 = arith.constant 0 : i32
    %c0_i32_0 = arith.constant 0 : i32
    return %arg0, %c0_i32 : i32, i32
  }
  func.func @transform_1(%arg0: i32) -> (i32, i32) {
    %c0_i32 = arith.constant 0 : i32
    %c0_i32_0 = arith.constant 0 : i32
    %c0_i32_1 = arith.constant 0 : i32
    return %c0_i32, %c0_i32_0 : i32, i32
  }
  func.func @transform_2(%arg0: i32) -> (i32, i32) {
    %c0_i32 = arith.constant 0 : i32
    %c0_i32_0 = arith.constant 0 : i32
    %c0_i32_1 = arith.constant 0 : i32
    return %c0_i32, %c0_i32_0 : i32, i32
  }
  func.func @transform_3(%arg0: i32) -> (i32, i32) {
    %c0_i32 = arith.constant 0 : i32
    %c0_i32_0 = arith.constant 0 : i32
    %c0_i32_1 = arith.constant 0 : i32
    return %c0_i32, %c0_i32_0 : i32, i32
  }
  func.func @transform_4(%arg0: i32) -> (i32, i32) {
    %c0_i32 = arith.constant 0 : i32
    %c0_i32_0 = arith.constant 0 : i32
    %c0_i32_1 = arith.constant 0 : i32
    return %c0_i32, %c0_i32_0 : i32, i32
  }
  func.func @transform_5(%arg0: i32) -> (i32, i32) {
    %c0_i32 = arith.constant 0 : i32
    %c0_i32_0 = arith.constant 0 : i32
    return %arg0, %c0_i32 : i32, i32
  }
}

</mosaic_0001>

<bundles_post_ra>
// kernel: tpu_custom_call.1
= control target key start
LH: loop header
LB: loop body
LE: loop exit
PB: predicated region body
PF: predicated region fallthrough
CT: control target
= control target key end

     0   :  { %10 = vsyncpa [#allocation3], 0  ;;  %s747_s0 = inlined_call_operand.vmem [shape: f32[8,32], index: 0, kind: input, shape index: {}]   ;;  %s748_s1 = inlined_call_operand.hbm [shape: f32[32,128], index: 1, kind: input, shape index: {}]   ;;  %s749_s2 = inlined_call_operand.vmem [shape: f32[128,128], index: 2, kind: input, shape index: {}]   ;;  %s750_s3 = inlined_call_operand.vmem [shape: f32[128,16], index: 3, kind: input, shape index: {}]   ;;  %s751_s4 = inlined_call_operand.vmem [shape: f32[8,128], index: 4, kind: input, shape index: {}]   ;;  %s752_s5 = inlined_call_operand.hbm [shape: f32[8,16], index: 5, kind: output, shape index: {}]  }
   0x1   :  { %11 = vsyncpa [#allocation4], 0  ;;  %s557_s18 = smov [#allocation2]   ;;  %s509_s22 = scalar_lea.hbm %s748_s1, 512 }
   0x2   :  { %s19_s19 = sshll.u32 %s557_s18, 4  ;;  %p510_p0 = scmp.ne.s32.totalorder %s748_s1, %s509_s22  ;;  %s20_s19 = int_to_ptr.vmem [resolvable:$true] %s19_s19 }
   0x3   :  { %p513_p1 = scmp.lt.u32.totalorder %s509_s22, %s748_s1 }
   0x5   :  { %p515_p2 = pnand %p513_p1, %p510_p0 }
   0x7   :  { %518 = shalt.err (!%p515_p2)
}
   0x8   :  { %s519_s27 = scalar_lea.vmem %s20_s19, 512  ;;  %p524_p4 = scmp.lt.s32.totalorder %s20_s19, %s20_s19 }
   0x9   :  { %p520_p3 = scmp.ne.s32.totalorder %s20_s19, %s519_s27  ;;  %p525_p5 = scmp.lt.s32.totalorder %s519_s27, %s519_s27 }
   0xb   :  { %p526_p6 = por %p525_p5, %p524_p4 }
   0xd   :  { %p527_p7 = pnand %p526_p6, %p520_p3 }
   0xf   :  { %530 = shalt.err (!%p527_p7)
}
  0x10   :  { %s558_s28 = smov 128   ;;  %s559_s29 = smov 8  }
  0x11   :  { %25 = dma.hbm_to_vmem [thread:$0]  %s748_s1, 512, %s20_s19, [#allocation3], %s558_s28, %s558_s28, %s559_s29  }
  0x12   :  { %553 = dma.done.wait [#allocation3], 512  }
  0x13   :  { %554 = vsyncadd [#allocation3], 4294966784  ;;  %v560_v0 = vmov 0.0|0.0   ;;  %vm561_vm0 = vmmov 0   ;;  %v562_v1 = vmov 0.0   ;;  %v39_v2 = vld [vmem:[#allocation2] sm:$0xff] }
  0x14   :  { %444 = vmatprep.subr.bf16.mxu0 %v560_v0  ;;  %371 = vmatprep.mubr.msk.f32.mxu0 %vm561_vm0, %v562_v1  ;;  %v40_v3 = vld [vmem:[#allocation2 + $0x8] sm:$0xff]  ;;  %v41_v4 = vld [vmem:[#allocation2 + $0x10] sm:$0xff]  ;;  %v42_v6 = vld [vmem:[#allocation2 + $0x18] sm:$0xff]  ;;  %vm47_vm1 = vcmask 261120   ;;  %vm303_vm2 = vcmask 130048  }
  0x15   :  { %450 = vmatprep.subr.bf16.mxu1 %v560_v0  ;;  %406 = vmatprep.mubr.msk.f32.mxu1 %vm561_vm0, %v562_v1  ;;  %v445_v5 = vpack.c.bf16 %v40_v3, %v39_v2  ;;  %v122_v7 = vld [vmem:[%s749_s2] sm:$0xff]  ;;  %v123_v8 = vld [vmem:[%s749_s2 + $0x8] sm:$0xff]  ;;  %v124_v9 = vld [vmem:[%s749_s2 + $0x10] sm:$0xff]  ;;  %v448_v11 = vpack.c.bf16 %v42_v6, %v41_v4 }
  0x16   :  { %v125_v10 = vld [vmem:[%s749_s2 + $0x18] sm:$0xff]  ;;  %v451_v12 = vpack.c.bf16 %v123_v8, %v122_v7  ;;  %v126_v14 = vld [vmem:[%s749_s2 + $0x20] sm:$0xff]  ;;  %v127_v15 = vld [vmem:[%s749_s2 + $0x28] sm:$0xff] }
  0x17   :  { %446 = vmatpush3.bf16.msra.mxu0 %v445_v5  ;;  %v454_v13 = vpack.c.bf16 %v125_v10, %v124_v9  ;;  %v35_v16 = vld [vmem:[%s747_s0] sm:$0xff]  ;;  %v457_v17 = vpack.c.bf16 %v127_v15, %v126_v14  ;;  %v128_v18 = vld [vmem:[%s749_s2 + $0x30] sm:$0xff]  ;;  %v129_v19 = vld [vmem:[%s749_s2 + $0x38] sm:$0xff] }
  0x18   :  { %447 = vmatprep.subr.bf16.mxu0 %v560_v0  ;;  %452 = vmatpush3.bf16.msra.mxu1 %v451_v12  ;;  %v460_v20 = vpack.c.bf16 %v129_v19, %v128_v18  ;;  %v130_v21 = vld [vmem:[%s749_s2 + $0x40] sm:$0xff]  ;;  %v131_v22 = vld [vmem:[%s749_s2 + $0x48] sm:$0xff]  ;;  %v132_v24 = vld [vmem:[%s749_s2 + $0x50] sm:$0xff] }
  0x19   :  { %453 = vmatprep.subr.bf16.mxu1 %v560_v0  ;;  %v463_v23 = vpack.c.bf16 %v131_v22, %v130_v21  ;;  %v133_v25 = vld [vmem:[%s749_s2 + $0x58] sm:$0xff]  ;;  %v134_v27 = vld [vmem:[%s749_s2 + $0x60] sm:$0xff]  ;;  %v135_v28 = vld [vmem:[%s749_s2 + $0x68] sm:$0xff] }
  0x1a   :  { %v466_v26 = vpack.c.bf16 %v133_v25, %v132_v24  ;;  %v469_v29 = vpack.c.bf16 %v135_v28, %v134_v27  ;;  %v136_v30 = vld [vmem:[%s749_s2 + $0x70] sm:$0xff]  ;;  %v137_v31 = vld [vmem:[%s749_s2 + $0x78] sm:$0xff]  ;;  %v213_v33 = vld [vmem:[%s750_s3] sm:$0xff] }
  0x1b   :  { %449 = vmatpush3.bf16.msra.mxu0 %v448_v11  ;;  %v472_v32 = vpack.c.bf16 %v137_v31, %v136_v30  ;;  %v214_v34 = vld [vmem:[%s750_s3 + $0x8] sm:$0xff]  ;;  %v215_v35 = vld [vmem:[%s750_s3 + $0x10] sm:$0xff]  ;;  %v216_v37 = vld [vmem:[%s750_s3 + $0x18] sm:$0xff] }
  0x1c   :  { %474 = vmatprep.subr.bf16.mxu0 %v560_v0  ;;  %455 = vmatpush3.bf16.msra.mxu1 %v454_v13  ;;  %v475_v36 = vpack.c.bf16 %v214_v34, %v213_v33  ;;  %v478_v38 = vpack.c.bf16 %v216_v37, %v215_v35  ;;  %v217_v39 = vld [vmem:[%s750_s3 + $0x20] sm:$0xff]  ;;  %v218_v40 = vld [vmem:[%s750_s3 + $0x28] sm:$0xff]  ;;  %v219_v42 = vld [vmem:[%s750_s3 + $0x30] sm:$0xff] }
  0x1d   :  { %456 = vmatprep.subr.bf16.mxu1 %v560_v0  ;;  %v481_v41 = vpack.c.bf16 %v218_v40, %v217_v39  ;;  %v220_v43 = vld [vmem:[%s750_s3 + $0x38] sm:$0xff]  ;;  %v221_v45 = vld [vmem:[%s750_s3 + $0x40] sm:$0xff]  ;;  %v222_v46 = vld [vmem:[%s750_s3 + $0x48] sm:$0xff] }
  0x1e   :  { %372 = vmatmul.mubr.msk.f32.vlgmr.msra.gmra.mrb[0].mxu0 %vm47_vm1, %v35_v16  ;;  %v484_v44 = vpack.c.bf16 %v220_v43, %v219_v42  ;;  %v487_v47 = vpack.c.bf16 %v222_v46, %v221_v45  ;;  %v320_v48 = vld [vmem:[%s751_s4] ss:$0 sm:$0xff]  ;;  %v223_v53 = vld [vmem:[%s750_s3 + $0x50] sm:$0xff]  ;;  %v224_v54 = vld [vmem:[%s750_s3 + $0x58] sm:$0xff] }
  0x1f   :  { %441 = vmatprep.mubr.msk.f32.mxu0 %vm561_vm0, %v562_v1  ;;  %476 = vmatpush3.bf16.msra.mxu0 %v475_v36  ;;  %v490_v55 = vpack.c.bf16 %v224_v54, %v223_v53  ;;  %v225_v56 = vld [vmem:[%s750_s3 + $0x60] sm:$0xff]  ;;  %v226_v57 = vld [vmem:[%s750_s3 + $0x68] sm:$0xff]  ;;  %v227_v59 = vld [vmem:[%s750_s3 + $0x70] sm:$0xff] }
  0x20   :  { %458 = vmatpush3.bf16.msra.mxu1 %v457_v17  ;;  %477 = vmatprep.subr.bf16.mxu0 %v560_v0  ;;  %v493_v58 = vpack.c.bf16 %v226_v57, %v225_v56  ;;  %v228_v60 = vld [vmem:[%s750_s3 + $0x78] sm:$0xff]  ;;  %v322_v62 = vld [vmem:[%s751_s4 + $0x1] ss:$0 sm:$0xff]  ;;  %v323_v4 = vld [vmem:[%s751_s4 + $0x2] ss:$0 sm:$0xff]  ;;  %s563_s3 = smov [#allocation5]  }
  0x21   :  { %459 = vmatprep.subr.bf16.mxu1 %v560_v0  ;;  %v496_v61 = vpack.c.bf16 %v228_v60, %v227_v59  ;;  %s311_s22 = sshll.u32 %s563_s3, 4  ;;  %s312_s22 = int_to_ptr.vmem [resolvable:$true] %s311_s22 }
  0x22   :  { %s531_s23 = scalar_lea.vmem %s312_s22, 128  ;;  %p536_p9 = scmp.lt.s32.totalorder %s312_s22, %s312_s22 }
  0x23   :  { %479 = vmatpush3.bf16.msra.mxu0 %v478_v38  ;;  %p532_p8 = scmp.ne.s32.totalorder %s312_s22, %s531_s23  ;;  %p537_p10 = scmp.lt.s32.totalorder %s531_s23, %s531_s23 }
  0x24   :  { %461 = vmatpush3.bf16.msra.mxu1 %v460_v20  ;;  %480 = vmatprep.subr.bf16.mxu0 %v560_v0 }
  0x25   :  { %462 = vmatprep.subr.bf16.mxu1 %v560_v0  ;;  %p538_p11 = por %p537_p10, %p536_p9 }
  0x27   :  { %482 = vmatpush3.bf16.msra.mxu0 %v481_v41  ;;  %p539_p12 = pnand %p538_p11, %p532_p8 }
  0x28   :  { %464 = vmatpush3.bf16.msra.mxu1 %v463_v23  ;;  %483 = vmatprep.subr.bf16.mxu0 %v560_v0 }
  0x29   :  { %465 = vmatprep.subr.bf16.mxu1 %v560_v0 }
  0x2b   :  { %485 = vmatpush3.bf16.msra.mxu0 %v484_v44 }
  0x2c   :  { %467 = vmatpush3.bf16.msra.mxu1 %v466_v26  ;;  %486 = vmatprep.subr.bf16.mxu0 %v560_v0 }
  0x2d   :  { %468 = vmatprep.subr.bf16.mxu1 %v560_v0 }
  0x2f   :  { %488 = vmatpush3.bf16.msra.mxu0 %v487_v47 }
  0x30   :  { %470 = vmatpush3.bf16.msra.mxu1 %v469_v29  ;;  %489 = vmatprep.subr.bf16.mxu0 %v560_v0 }
  0x31   :  { %471 = vmatprep.subr.bf16.mxu1 %v560_v0 }
  0x33   :  { %491 = vmatpush3.bf16.msra.mxu0 %v490_v55 }
  0x34   :  { %473 = vmatpush3.bf16.msra.mxu1 %v472_v32  ;;  %492 = vmatprep.subr.bf16.mxu0 %v560_v0 }
  0x37   :  { %494 = vmatpush3.bf16.msra.mxu0 %v493_v58 }
  0x38   :  { %495 = vmatprep.subr.bf16.mxu0 %v560_v0 }
  0x3b   :  { %497 = vmatpush3.bf16.msra.mxu0 %v496_v61 }
  0xf1   :  { %v117_v49 = vpop.f32.mrb[0].mxu0 }
  0xf2   :  { %v118_v50 = vadd.f32 %v320_v48, %v117_v49  ;;  %v373_v51 = vpop.f32.mrb[1].mxu0 }
  0xf4   :  { %505 = vtanh.f32 %v118_v50 }
  0xfe   :  { %v506_v52 = vpop.eup %505 }
  0xff   :  { %407 = vmatmul.mubr.f32.vlgmr.msra.gmra.mrb[0].mxu1 %v506_v52 }
 0x1d2   :  { %v208_v63 = vpop.f32.mrb[0].mxu1 }
 0x1d3   :  { %v209_v1 = vadd.f32 %v322_v62, %v208_v63  ;;  %v408_v2 = vpop.f32.mrb[1].mxu1 }
 0x1d5   :  { %507 = vtanh.f32 %v209_v1 }
 0x1df   :  { %v508_v3 = vpop.eup %507 }
 0x1e0   :  { %442 = vmatmul.mubr.f32.vlgmr.msra.gmra.mrb[2].mxu0 %v508_v3 }
 0x2b3   :  { %v299_v5 = vpop.f32.mrb[2].mxu0 }
 0x2b4   :  { %v300_v0 = vadd.f32 %v323_v4, %v299_v5  ;;  %v443_v6 = vpop.f32.mrb[3].mxu0 }
 0x2b6   :  { %304 = vst.msk [vmem:[#allocation5] sm:$0xff] %vm303_vm2, %v300_v0 }
 0x2b7   :  { %542 = shalt.err (!%p539_p12)
}
 0x2b8   :  { %s543_s25 = scalar_lea.hbm %s752_s5, 128 }
 0x2b9   :  { %p544_p13 = scmp.ne.s32.totalorder %s752_s5, %s543_s25  ;;  %p547_p0 = scmp.lt.u32.totalorder %s543_s25, %s752_s5 }
 0x2bb   :  { %p549_p1 = pnand %p547_p0, %p544_p13 }
 0x2bd   :  { %552 = shalt.err (!%p549_p1)
}
 0x2be   :  { %314 = dma.vmem_to_hbm [thread:$0]  %s312_s22, 128, %s752_s5, [#allocation4]  }
 0x2bf   :  { %555 = dma.done.wait [#allocation4], 128  }
 0x2c0   :  { %556 = vsyncadd [#allocation4], 4294967168 }
 0x2c1   :  { %318 = vsyncpa [#allocation3], 1 }
 0x2c2   :  { %319 = vsyncpa [#allocation4], 1 }

</bundles_post_ra>
